<compile_context>
chip_gen: v5e
topology: v5e:2x2
jax: 0.10.0
libtpu: 0.0.40
codegen_flags: <defaults>
</compile_context>

<pallas_src>
import functools

import jax
import jax.numpy as jnp
from jax.experimental import pallas as pl
from jax.experimental.pallas import tpu as pltpu


# ----------------------------------------------------------------------------
# GRU recurrence kernel: grid = (num_directions, T), hidden carried in scratch
# ----------------------------------------------------------------------------
def gru_step_kernel(pos_ref, gi_ref, whh_ref, bhn_ref, out_ref, h_sc,
                    *, hidden_dim, seq_len):
    """One (direction, timestep) grid point.

    pos_ref : [B, 1]  int32  replacement positions
    gi_ref  : [B, 3H] f32    precomputed x@W_ih + b_ih (+ b_hr, b_hz folded)
    whh_ref : [H, 3H] bf16   recurrent weights for this direction
    bhn_ref : [1, H]  f32    b_hn (must stay inside r * (.) term)
    out_ref : [B, H]  f32    hidden state at `position` (resident across T)
    h_sc    : [B, H]  f32    carried hidden state
    """
    d = pl.program_id(0)
    s = pl.program_id(1)
    H = hidden_dim
    T = seq_len

    @pl.when(s == 0)
    def _():
        h_sc[...] = jnp.zeros_like(h_sc)
        out_ref[...] = jnp.zeros_like(out_ref)

    h = h_sc[...]                                               # [B, H] f32
    gi = gi_ref[...]                                            # [B, 3H] f32
    gh = jnp.dot(h.astype(jnp.bfloat16), whh_ref[...],
                 preferred_element_type=jnp.float32)            # [B, 3H] f32

    # PyTorch gate order (r, z, n); b_ih, b_hr, b_hz already folded into gi.
    r = jax.nn.sigmoid(gi[:, 0:H] + gh[:, 0:H])
    z = jax.nn.sigmoid(gi[:, H:2 * H] + gh[:, H:2 * H])
    n = jnp.tanh(gi[:, 2 * H:3 * H] + r * (gh[:, 2 * H:3 * H] + bhn_ref[...]))
    h_new = (1.0 - z) * n + z * h
    h_sc[...] = h_new

    # Time index of this step: forward d=0 -> s, backward d=1 -> T-1-s.
    t = s + d * (T - 1 - 2 * s)
    write_mask = pos_ref[...] == t                              # [B, 1] bool
    out_ref[...] = jnp.where(write_mask, h_new, out_ref[...])


def run_gru(gi_all, whh_all, bhn_all, pos2d, *, hidden_dim, seq_len):
    """gi_all: [D, T, B, 3H] f32, whh_all: [D, H, 3H] bf16, bhn_all: [D, 1, H] f32,
    pos2d: [B, 1] int32.  Returns hidden-at-position: [D, B, H] f32."""
    D, T, B, G = gi_all.shape
    H = hidden_dim
    kernel = functools.partial(gru_step_kernel, hidden_dim=H, seq_len=T)
    return pl.pallas_call(
        kernel,
        grid=(D, T),
        in_specs=[
            pl.BlockSpec((B, 1), lambda d, s: (0, 0)),                         # pos
            pl.BlockSpec((None, None, B, G),
                         lambda d, s: (d, s + d * (T - 1 - 2 * s), 0, 0)),     # gi
            pl.BlockSpec((None, H, G), lambda d, s: (d, 0, 0)),                # W_hh
            pl.BlockSpec((None, 1, H), lambda d, s: (d, 0, 0)),                # b_hn
        ],
        out_specs=pl.BlockSpec((None, B, H), lambda d, s: (d, 0, 0)),
        out_shape=jax.ShapeDtypeStruct((D, B, H), jnp.float32),
        scratch_shapes=[pltpu.VMEM((B, H), jnp.float32)],
        compiler_params=pltpu.CompilerParams(
            dimension_semantics=("parallel", "arbitrary"),
            vmem_limit_bytes=32 * 1024 * 1024),
    )(pos2d, gi_all, whh_all, bhn_all)


# ----------------------------------------------------------------------------
# Dense head kernel, tiled over vocab: logits + online softmax-max + argmax
# ----------------------------------------------------------------------------
def head_kernel(x_ref, w_ref, b_ref, logits_ref, prob_ref, idx_ref,
                m_sc, l_sc, a_sc, *, tile_v):
    """x: [B, Hd] bf16, w: [Hd, TILE_V] bf16, b: [1, TILE_V] f32.

    logits_ref: [B, TILE_V] f32 (lane-dense tile of the dense output)
    prob_ref  : [B, 128]    f32 (max softmax prob, broadcast over lanes)
    idx_ref   : [B, 128]    i32 (argmax token id, broadcast over lanes)
    """
    j = pl.program_id(0)

    @pl.when(j == 0)
    def _():
        m_sc[...] = jnp.full_like(m_sc, -jnp.inf)
        l_sc[...] = jnp.zeros_like(l_sc)
        a_sc[...] = jnp.zeros_like(a_sc)
        prob_ref[...] = jnp.zeros_like(prob_ref)
        idx_ref[...] = jnp.zeros_like(idx_ref)

    logits = jnp.dot(x_ref[...], w_ref[...],
                     preferred_element_type=jnp.float32) + b_ref[...]
    logits_ref[...] = logits                                    # [B, TILE_V]

    tile_max = jnp.max(logits, axis=-1, keepdims=True)          # [B, 1]
    lane = jax.lax.broadcasted_iota(jnp.int32, logits.shape, 1) + j * tile_v
    tile_arg = jnp.min(jnp.where(logits == tile_max, lane, jnp.int32(2 ** 30)),
                       axis=-1, keepdims=True)                  # first occurrence

    m_old = m_sc[...]
    m_new = jnp.maximum(m_old, tile_max)
    l_sc[...] = (l_sc[...] * jnp.exp(m_old - m_new)
                 + jnp.sum(jnp.exp(logits - m_new), axis=-1, keepdims=True))
    m_sc[...] = m_new
    # Strictly-greater keeps first-occurrence tie-breaking across tiles.
    a_sc[...] = jnp.where(tile_max > m_old, tile_arg, a_sc[...])

    @pl.when(j == pl.num_programs(0) - 1)
    def _():
        # max softmax prob = exp(max - m_final) / l_final = 1 / l_final
        prob_ref[...] = jnp.broadcast_to(1.0 / l_sc[...], prob_ref.shape)
        idx_ref[...] = jnp.broadcast_to(a_sc[...], idx_ref.shape)


def run_head(x_bh, w, b):
    """x_bh: [B, Hd] bf16, w: [Hd, V] bf16, b: [V] f32.
    Returns (logits [B, V] f32, max_prob [B] f32, argmax [B] i32)."""
    B, Hd = x_bh.shape
    V = w.shape[1]
    tile_v = 512 if V >= 512 else 128
    v_pad = ((V + tile_v - 1) // tile_v) * tile_v
    if v_pad != V:
        w = jnp.pad(w, ((0, 0), (0, v_pad - V)))
        b = jnp.pad(b, ((0, v_pad - V),), constant_values=-1e30)
    w = w.astype(jnp.bfloat16)
    b2 = b.reshape(1, v_pad).astype(jnp.float32)
    n_tiles = v_pad // tile_v

    kernel = functools.partial(head_kernel, tile_v=tile_v)
    logits_pad, prob_slab, idx_slab = pl.pallas_call(
        kernel,
        grid=(n_tiles,),
        in_specs=[
            pl.BlockSpec((B, Hd), lambda j: (0, 0)),
            pl.BlockSpec((Hd, tile_v), lambda j: (0, j)),
            pl.BlockSpec((1, tile_v), lambda j: (0, j)),
        ],
        out_specs=(
            pl.BlockSpec((B, tile_v), lambda j: (0, j)),
            pl.BlockSpec((B, 128), lambda j: (0, 0)),
            pl.BlockSpec((B, 128), lambda j: (0, 0)),
        ),
        out_shape=(
            jax.ShapeDtypeStruct((B, v_pad), jnp.float32),
            jax.ShapeDtypeStruct((B, 128), jnp.float32),
            jax.ShapeDtypeStruct((B, 128), jnp.int32),
        ),
        scratch_shapes=[pltpu.VMEM((B, 1), jnp.float32),
                        pltpu.VMEM((B, 1), jnp.float32),
                        pltpu.VMEM((B, 1), jnp.int32)],
        compiler_params=pltpu.CompilerParams(
            dimension_semantics=("arbitrary",),
            vmem_limit_bytes=32 * 1024 * 1024),
    )(x_bh, w, b2)
    return logits_pad[:, :V], prob_slab[:, 0], idx_slab[:, 0]


# ----------------------------------------------------------------------------
# Parameters (shapes follow nn.Embedding / nn.GRU(num_layers=1) / nn.Linear)
# ----------------------------------------------------------------------------
def make_params(key, vocab_size, embedding_dim, hidden_dim, bidirectional):
    D = 2 if bidirectional else 1
    H = hidden_dim
    keys = jax.random.split(key, 7)
    params = {}
    params["embedding"] = 0.1 * jax.random.normal(
        keys[0], (vocab_size, embedding_dim), jnp.float32)
    # Per-direction GRU weights, stored transposed vs. PyTorch and (for MXU
    # operands) in bf16: W_ih [D, E, 3H], W_hh [D, H, 3H], biases f32 [D, 3H].
    params["wih"] = (0.1 * jax.random.normal(
        keys[1], (D, embedding_dim, 3 * H), jnp.float32)).astype(jnp.bfloat16)
    params["whh"] = (0.1 * jax.random.normal(
        keys[2], (D, H, 3 * H), jnp.float32)).astype(jnp.bfloat16)
    params["bih"] = 0.1 * jax.random.normal(keys[3], (D, 3 * H), jnp.float32)
    params["bhh"] = 0.1 * jax.random.normal(keys[4], (D, 3 * H), jnp.float32)
    dense_in = H * D
    params["dense_w"] = (0.1 * jax.random.normal(
        keys[5], (dense_in, vocab_size), jnp.float32)).astype(jnp.bfloat16)
    params["dense_b"] = 0.1 * jax.random.normal(keys[6], (vocab_size,), jnp.float32)
    return params


# ----------------------------------------------------------------------------
# The Replace module forward pass
# ----------------------------------------------------------------------------
def replace_forward(params, sentences, position, length, *, hidden_dim, bidirectional):
    """sentences: [B, T] int32, position: [B] int32, length: [B] int32.
    Returns (logits [B,V], decision_probs [B], sentences_replaced [B,T], length [B])."""
    B, T = sentences.shape
    H = hidden_dim
    D = 2 if bidirectional else 1

    # Embedding lookup (glue).
    embedded = jnp.take(params["embedding"], sentences, axis=0)       # [B, T, E]
    x_tbe = jnp.transpose(embedded, (1, 0, 2)).astype(jnp.bfloat16)   # [T, B, E]

    # Hoisted input projection over all timesteps & both directions (one
    # batched bf16 matmul). b_ih and the r/z parts of b_hh are folded in;
    # b_hn must stay inside the recurrence (it sits inside r * (.)).
    bih, bhh = params["bih"], params["bhh"]
    bias_fold = bih + jnp.concatenate(
        [bhh[:, :2 * H], jnp.zeros((D, H), jnp.float32)], axis=-1)    # [D, 3H]
    gi_all = jnp.einsum("tbe,deg->dtbg", x_tbe, params["wih"],
                        preferred_element_type=jnp.float32)
    gi_all = gi_all + bias_fold[:, None, None, :]                     # [D, T, B, 3H]
    bhn_all = bhh[:, 2 * H:].reshape(D, 1, H)                         # [D, 1, H]

    pos2d = position.reshape(B, 1).astype(jnp.int32)

    # GRU recurrence (Pallas): returns only output[b, position[b], :] per dir.
    h_at_pos = run_gru(gi_all, params["whh"], bhn_all, pos2d,
                       hidden_dim=H, seq_len=T)                       # [D, B, H]

    # [fwd, bwd] concat per batch row (matches torch bidirectional layout).
    output_position = jnp.transpose(h_at_pos, (1, 0, 2)).reshape(B, D * H)

    # Dense + softmax max-prob + argmax (Pallas, tiled over vocab).
    logits, decision_probs, decision_index = run_head(
        output_position.astype(jnp.bfloat16), params["dense_w"], params["dense_b"])

    # Replace the chosen token at `position` (glue).
    sentences_replaced = sentences.at[jnp.arange(B), position].set(
        decision_index.astype(sentences.dtype))

    return logits, decision_probs, sentences_replaced, length


if __name__ == "__main__":
    batch_size = 2
    seq_len = 8
    vocab_size = 128
    embedding_dim = 32
    hidden_dim = 32
    bidirectional = True
    # num_layers = 1, dropout only applies between layers -> no-op here.
    # TODO(synk): random_sample=True (multinomial sampling) path not implemented;
    # this reproduces the deterministic (eval / argmax) branch.

    key = jax.random.PRNGKey(0)
    kp, ks, kpos = jax.random.split(key, 3)

    params = make_params(kp, vocab_size, embedding_dim, hidden_dim, bidirectional)
    sentences = jax.random.randint(ks, (batch_size, seq_len), 0, vocab_size, dtype=jnp.int32)
    position = jax.random.randint(kpos, (batch_size,), 0, seq_len, dtype=jnp.int32)
    length = jnp.full((batch_size,), seq_len, dtype=jnp.int32)

    fwd = jax.jit(functools.partial(replace_forward,
                                    hidden_dim=hidden_dim,
                                    bidirectional=bidirectional))
    logits, decision_probs, sentences_replaced, length_out = fwd(
        params, sentences, position, length)
    jax.block_until_ready((logits, decision_probs, sentences_replaced, length_out))

    assert logits.shape == (batch_size, vocab_size)
    assert decision_probs.shape == (batch_size,)
    assert sentences_replaced.shape == (batch_size, seq_len)
    assert length_out.shape == (batch_size,)
    print("KERNEL_OK")
</pallas_src>

<mosaic_0001>
module attributes {stable_mosaic.version = 11 : i64} {
  func.func @gru_step_kernel(%arg0: i32, %arg1: i32, %arg2: memref<2x1xi32, #tpu.memory_space<vmem>>, %arg3: memref<1x1x2x96xf32, #tpu.memory_space<vmem>>, %arg4: memref<1x32x96xbf16, #tpu.memory_space<vmem>>, %arg5: memref<1x1x32xf32, #tpu.memory_space<vmem>>, %arg6: memref<1x2x32xf32, #tpu.memory_space<vmem>>, %arg7: memref<2x32xf32, #tpu.memory_space<vmem>>) attributes {dimension_semantics = [#tpu.dimension_semantics<parallel>, #tpu.dimension_semantics<arbitrary>], iteration_bounds = array<i64: 2, 8>, scalar_prefetch = 0 : i64, scratch_operands = 1 : i64, tpu.core_type = #tpu.core_type<tc>, window_params = [{pipeline_mode = #tpu.pipeline_mode<synchronous>, transform_indices = @transform_0, window_bounds = array<i64: 2, 1>}, {transform_indices = @transform_1, window_bounds = array<i64: 1, 1, 2, 96>}, {transform_indices = @transform_2, window_bounds = array<i64: 1, 32, 96>}, {transform_indices = @transform_3, window_bounds = array<i64: 1, 1, 32>}, {transform_indices = @transform_4, window_bounds = array<i64: 1, 2, 32>}]} {
    %c0_i32 = arith.constant 0 : i32
    %0 = arith.cmpi eq, %arg1, %c0_i32 : i32
    %1 = arith.extui %0 : i1 to i32
    %c0_i32_0 = arith.constant 0 : i32
    %2 = arith.cmpi ne, %1, %c0_i32_0 : i32
    scf.if %2 {
      %cst_25 = arith.constant 0.000000e+00 : f32
      %56 = vector.broadcast %cst_25 : f32 to vector<2x32xf32>
      %c0_26 = arith.constant 0 : index
      %c0_27 = arith.constant 0 : index
      %57 = vector.load %arg7[%c0_26, %c0_27] : memref<2x32xf32, #tpu.memory_space<vmem>>, vector<2x32xf32>
      tpu.vector_store %arg7[%c0_26, %c0_27], %56 {strides = array<i32>} : memref<2x32xf32, #tpu.memory_space<vmem>>, vector<2x32xf32>,
      %cst_28 = arith.constant 0.000000e+00 : f32
      %58 = vector.broadcast %cst_28 : f32 to vector<2x32xf32>
      %c0_29 = arith.constant 0 : index
      %c0_30 = arith.constant 0 : index
      %c0_31 = arith.constant 0 : index
      %59 = vector.load %arg6[%c0_29, %c0_30, %c0_31] : memref<1x2x32xf32, #tpu.memory_space<vmem>>, vector<1x2x32xf32>
      %60 = vector.shape_cast %59 : vector<1x2x32xf32> to vector<2x32xf32>
      %61 = vector.shape_cast %58 : vector<2x32xf32> to vector<1x2x32xf32>
      tpu.vector_store %arg6[%c0_29, %c0_30, %c0_31], %61 {strides = array<i32>} : memref<1x2x32xf32, #tpu.memory_space<vmem>>, vector<1x2x32xf32>,
    } else {
    }
    %c0 = arith.constant 0 : index
    %c0_1 = arith.constant 0 : index
    %3 = vector.load %arg7[%c0, %c0_1] : memref<2x32xf32, #tpu.memory_space<vmem>>, vector<2x32xf32>
    %c0_2 = arith.constant 0 : index
    %c0_3 = arith.constant 0 : index
    %c0_4 = arith.constant 0 : index
    %c0_5 = arith.constant 0 : index
    %4 = vector.load %arg3[%c0_2, %c0_3, %c0_4, %c0_5] : memref<1x1x2x96xf32, #tpu.memory_space<vmem>>, vector<1x1x2x96xf32>
    %5 = vector.shape_cast %4 : vector<1x1x2x96xf32> to vector<2x96xf32>
    %6 = arith.truncf %3 : vector<2x32xf32> to vector<2x32xbf16>
    %c0_6 = arith.constant 0 : index
    %c0_7 = arith.constant 0 : index
    %c0_8 = arith.constant 0 : index
    %7 = vector.load %arg4[%c0_6, %c0_7, %c0_8] : memref<1x32x96xbf16, #tpu.memory_space<vmem>>, vector<1x32x96xbf16>
    %8 = vector.shape_cast %7 : vector<1x32x96xbf16> to vector<32x96xbf16>
    %cst = arith.constant dense<0.000000e+00> : vector<2x96xf32>
    %9 = tpu.matmul %6, %8, %cst {dimension_numbers = #tpu.dot_dimension_numbers<[1], [0], [0], [1], [0, 0, 1, 1], [], []>} : vector<2x32xbf16>, vector<32x96xbf16>, vector<2x96xf32> -> vector<2x96xf32>
    %10 = vector.extract_strided_slice %5 {offsets = [0, 0], sizes = [2, 32], strides = [1, 1]} : vector<2x96xf32> to vector<2x32xf32>
    %11 = vector.extract_strided_slice %9 {offsets = [0, 0], sizes = [2, 32], strides = [1, 1]} : vector<2x96xf32> to vector<2x32xf32>
    %12 = arith.addf %10, %11 : vector<2x32xf32>
    %13 = arith.negf %12 : vector<2x32xf32>
    %14 = math.exp %13 : vector<2x32xf32>
    %cst_9 = arith.constant 1.000000e+00 : f32
    %15 = vector.broadcast %cst_9 : f32 to vector<2x32xf32>
    %16 = arith.addf %15, %14 : vector<2x32xf32>
    %17 = arith.divf %15, %16 : vector<2x32xf32>
    %18 = vector.extract_strided_slice %5 {offsets = [0, 32], sizes = [2, 32], strides = [1, 1]} : vector<2x96xf32> to vector<2x32xf32>
    %19 = vector.extract_strided_slice %9 {offsets = [0, 32], sizes = [2, 32], strides = [1, 1]} : vector<2x96xf32> to vector<2x32xf32>
    %20 = arith.addf %18, %19 : vector<2x32xf32>
    %21 = arith.negf %20 : vector<2x32xf32>
    %22 = math.exp %21 : vector<2x32xf32>
    %cst_10 = arith.constant 1.000000e+00 : f32
    %23 = vector.broadcast %cst_10 : f32 to vector<2x32xf32>
    %24 = arith.addf %23, %22 : vector<2x32xf32>
    %25 = arith.divf %23, %24 : vector<2x32xf32>
    %26 = vector.extract_strided_slice %5 {offsets = [0, 64], sizes = [2, 32], strides = [1, 1]} : vector<2x96xf32> to vector<2x32xf32>
    %27 = vector.extract_strided_slice %9 {offsets = [0, 64], sizes = [2, 32], strides = [1, 1]} : vector<2x96xf32> to vector<2x32xf32>
    %c0_11 = arith.constant 0 : index
    %c0_12 = arith.constant 0 : index
    %c0_13 = arith.constant 0 : index
    %28 = vector.load %arg5[%c0_11, %c0_12, %c0_13] : memref<1x1x32xf32, #tpu.memory_space<vmem>>, vector<1x1x32xf32>
    %29 = vector.shape_cast %28 : vector<1x1x32xf32> to vector<1x32xf32>
    %30 = vector.broadcast %29 : vector<1x32xf32> to vector<2x32xf32>
    %31 = arith.addf %27, %30 : vector<2x32xf32>
    %32 = arith.mulf %17, %31 : vector<2x32xf32>
    %33 = arith.addf %26, %32 : vector<2x32xf32>
    %34 = math.tanh %33 : vector<2x32xf32>
    %cst_14 = arith.constant 1.000000e+00 : f32
    %35 = vector.broadcast %cst_14 : f32 to vector<2x32xf32>
    %36 = arith.subf %35, %25 : vector<2x32xf32>
    %37 = arith.mulf %36, %34 : vector<2x32xf32>
    %38 = arith.mulf %25, %3 : vector<2x32xf32>
    %39 = arith.addf %37, %38 : vector<2x32xf32>
    %c0_15 = arith.constant 0 : index
    %c0_16 = arith.constant 0 : index
    %40 = vector.load %arg7[%c0_15, %c0_16] : memref<2x32xf32, #tpu.memory_space<vmem>>, vector<2x32xf32>
    tpu.vector_store %arg7[%c0_15, %c0_16], %39 {strides = array<i32>} : memref<2x32xf32, #tpu.memory_space<vmem>>, vector<2x32xf32>,
    %c2_i32 = arith.constant 2 : i32
    %41 = arith.muli %c2_i32, %arg1 : i32
    %c7_i32 = arith.constant 7 : i32
    %42 = arith.subi %c7_i32, %41 : i32
    %43 = arith.muli %arg0, %42 : i32
    %44 = arith.addi %arg1, %43 : i32
    %c0_17 = arith.constant 0 : index
    %c0_18 = arith.constant 0 : index
    %45 = vector.load %arg2[%c0_17, %c0_18] : memref<2x1xi32, #tpu.memory_space<vmem>>, vector<2x1xi32>
    %46 = vector.broadcast %44 : i32 to vector<2x1xi32>
    %47 = arith.cmpi eq, %45, %46 : vector<2x1xi32>
    %c0_19 = arith.constant 0 : index
    %c0_20 = arith.constant 0 : index
    %c0_21 = arith.constant 0 : index
    %48 = vector.load %arg6[%c0_19, %c0_20, %c0_21] : memref<1x2x32xf32, #tpu.memory_space<vmem>>, vector<1x2x32xf32>
    %49 = vector.shape_cast %48 : vector<1x2x32xf32> to vector<2x32xf32>
    %50 = vector.shape_cast %47 : vector<2x1xi1> to vector<2x1xi1>
    %51 = vector.broadcast %50 : vector<2x1xi1> to vector<2x32xi1>
    %52 = arith.select %51, %39, %49 : vector<2x32xi1>, vector<2x32xf32>
    %c0_22 = arith.constant 0 : index
    %c0_23 = arith.constant 0 : index
    %c0_24 = arith.constant 0 : index
    %53 = vector.load %arg6[%c0_22, %c0_23, %c0_24] : memref<1x2x32xf32, #tpu.memory_space<vmem>>, vector<1x2x32xf32>
    %54 = vector.shape_cast %53 : vector<1x2x32xf32> to vector<2x32xf32>
    %55 = vector.shape_cast %52 : vector<2x32xf32> to vector<1x2x32xf32>
    tpu.vector_store %arg6[%c0_22, %c0_23, %c0_24], %55 {strides = array<i32>} : memref<1x2x32xf32, #tpu.memory_space<vmem>>, vector<1x2x32xf32>,
    return
  }
  func.func @transform_0(%arg0: i32, %arg1: i32) -> (i32, i32) {
    %c0_i32 = arith.constant 0 : i32
    %c0_i32_0 = arith.constant 0 : i32
    %c0_i32_1 = arith.constant 0 : i32
    return %c0_i32, %c0_i32_0 : i32, i32
  }
  func.func @transform_1(%arg0: i32, %arg1: i32) -> (i32, i32, i32, i32) {
    %c2_i32 = arith.constant 2 : i32
    %0 = arith.muli %c2_i32, %arg1 : i32
    %c7_i32 = arith.constant 7 : i32
    %1 = arith.subi %c7_i32, %0 : i32
    %2 = arith.muli %arg0, %1 : i32
    %3 = arith.addi %arg1, %2 : i32
    %c0_i32 = arith.constant 0 : i32
    %c0_i32_0 = arith.constant 0 : i32
    %c0_i32_1 = arith.constant 0 : i32
    return %arg0, %3, %c0_i32, %c0_i32_0 : i32, i32, i32, i32
  }
  func.func @transform_2(%arg0: i32, %arg1: i32) -> (i32, i32, i32) {
    %c0_i32 = arith.constant 0 : i32
    %c0_i32_0 = arith.constant 0 : i32
    %c0_i32_1 = arith.constant 0 : i32
    return %arg0, %c0_i32, %c0_i32_0 : i32, i32, i32
  }
  func.func @transform_3(%arg0: i32, %arg1: i32) -> (i32, i32, i32) {
    %c0_i32 = arith.constant 0 : i32
    %c0_i32_0 = arith.constant 0 : i32
    %c0_i32_1 = arith.constant 0 : i32
    return %arg0, %c0_i32, %c0_i32_0 : i32, i32, i32
  }
  func.func @transform_4(%arg0: i32, %arg1: i32) -> (i32, i32, i32) {
    %c0_i32 = arith.constant 0 : i32
    %c0_i32_0 = arith.constant 0 : i32
    %c0_i32_1 = arith.constant 0 : i32
    return %arg0, %c0_i32, %c0_i32_0 : i32, i32, i32
  }
}

module attributes {stable_mosaic.version = 11 : i64} {
  func.func @head_kernel(%arg0: i32, %arg1: memref<2x64xbf16, #tpu.memory_space<vmem>>, %arg2: memref<64x128xbf16, #tpu.memory_space<vmem>>, %arg3: memref<1x128xf32, #tpu.memory_space<vmem>>, %arg4: memref<2x128xf32, #tpu.memory_space<vmem>>, %arg5: memref<2x128xf32, #tpu.memory_space<vmem>>, %arg6: memref<2x128xi32, #tpu.memory_space<vmem>>, %arg7: memref<2x1xf32, #tpu.memory_space<vmem>>, %arg8: memref<2x1xf32, #tpu.memory_space<vmem>>, %arg9: memref<2x1xi32, #tpu.memory_space<vmem>>) attributes {dimension_semantics = [#tpu.dimension_semantics<arbitrary>], iteration_bounds = array<i64: 1>, scalar_prefetch = 0 : i64, scratch_operands = 3 : i64, tpu.core_type = #tpu.core_type<tc>, window_params = [{pipeline_mode = #tpu.pipeline_mode<synchronous>, transform_indices = @transform_0, window_bounds = array<i64: 2, 64>}, {transform_indices = @transform_1, window_bounds = array<i64: 64, 128>}, {transform_indices = @transform_2, window_bounds = array<i64: 1, 128>}, {transform_indices = @transform_3, window_bounds = array<i64: 2, 128>}, {pipeline_mode = #tpu.pipeline_mode<synchronous>, transform_indices = @transform_4, window_bounds = array<i64: 2, 128>}, {pipeline_mode = #tpu.pipeline_mode<synchronous>, transform_indices = @transform_5, window_bounds = array<i64: 2, 128>}]} {
    %c0_i32 = arith.constant 0 : i32
    %0 = arith.cmpi eq, %arg0, %c0_i32 : i32
    %1 = arith.extui %0 : i1 to i32
    %c0_i32_0 = arith.constant 0 : i32
    %2 = arith.cmpi ne, %1, %c0_i32_0 : i32
    scf.if %2 {
      %cst_25 = arith.constant 0xFF800000 : f32
      %43 = vector.broadcast %cst_25 : f32 to vector<2x1xf32>
      %c0_26 = arith.constant 0 : index
      %c0_27 = arith.constant 0 : index
      %44 = vector.load %arg7[%c0_26, %c0_27] : memref<2x1xf32, #tpu.memory_space<vmem>>, vector<2x1xf32>
      tpu.vector_store %arg7[%c0_26, %c0_27], %43 {strides = array<i32>} : memref<2x1xf32, #tpu.memory_space<vmem>>, vector<2x1xf32>,
      %cst_28 = arith.constant 0.000000e+00 : f32
      %45 = vector.broadcast %cst_28 : f32 to vector<2x1xf32>
      %c0_29 = arith.constant 0 : index
      %c0_30 = arith.constant 0 : index
      %46 = vector.load %arg8[%c0_29, %c0_30] : memref<2x1xf32, #tpu.memory_space<vmem>>, vector<2x1xf32>
      tpu.vector_store %arg8[%c0_29, %c0_30], %45 {strides = array<i32>} : memref<2x1xf32, #tpu.memory_space<vmem>>, vector<2x1xf32>,
      %c0_i32_31 = arith.constant 0 : i32
      %47 = vector.broadcast %c0_i32_31 : i32 to vector<2x1xi32>
      %c0_32 = arith.constant 0 : index
      %c0_33 = arith.constant 0 : index
      %48 = vector.load %arg9[%c0_32, %c0_33] : memref<2x1xi32, #tpu.memory_space<vmem>>, vector<2x1xi32>
      tpu.vector_store %arg9[%c0_32, %c0_33], %47 {strides = array<i32>} : memref<2x1xi32, #tpu.memory_space<vmem>>, vector<2x1xi32>,
      %cst_34 = arith.constant 0.000000e+00 : f32
      %49 = vector.broadcast %cst_34 : f32 to vector<2x128xf32>
      %c0_35 = arith.constant 0 : index
      %c0_36 = arith.constant 0 : index
      %50 = vector.load %arg5[%c0_35, %c0_36] : memref<2x128xf32, #tpu.memory_space<vmem>>, vector<2x128xf32>
      tpu.vector_store %arg5[%c0_35, %c0_36], %49 {strides = array<i32>} : memref<2x128xf32, #tpu.memory_space<vmem>>, vector<2x128xf32>,
      %c0_i32_37 = arith.constant 0 : i32
      %51 = vector.broadcast %c0_i32_37 : i32 to vector<2x128xi32>
      %c0_38 = arith.constant 0 : index
      %c0_39 = arith.constant 0 : index
      %52 = vector.load %arg6[%c0_38, %c0_39] : memref<2x128xi32, #tpu.memory_space<vmem>>, vector<2x128xi32>
      tpu.vector_store %arg6[%c0_38, %c0_39], %51 {strides = array<i32>} : memref<2x128xi32, #tpu.memory_space<vmem>>, vector<2x128xi32>,
    } else {
    }
    %c0 = arith.constant 0 : index
    %c0_1 = arith.constant 0 : index
    %3 = vector.load %arg1[%c0, %c0_1] : memref<2x64xbf16, #tpu.memory_space<vmem>>, vector<2x64xbf16>
    %c0_2 = arith.constant 0 : index
    %c0_3 = arith.constant 0 : index
    %4 = vector.load %arg2[%c0_2, %c0_3] : memref<64x128xbf16, #tpu.memory_space<vmem>>, vector<64x128xbf16>
    %cst = arith.constant dense<0.000000e+00> : vector<2x128xf32>
    %5 = tpu.matmul %3, %4, %cst {dimension_numbers = #tpu.dot_dimension_numbers<[1], [0], [0], [1], [0, 0, 1, 1], [], []>} : vector<2x64xbf16>, vector<64x128xbf16>, vector<2x128xf32> -> vector<2x128xf32>
    %c0_4 = arith.constant 0 : index
    %c0_5 = arith.constant 0 : index
    %6 = vector.load %arg3[%c0_4, %c0_5] : memref<1x128xf32, #tpu.memory_space<vmem>>, vector<1x128xf32>
    %7 = vector.broadcast %6 : vector<1x128xf32> to vector<2x128xf32>
    %8 = arith.addf %5, %7 : vector<2x128xf32>
    %c0_6 = arith.constant 0 : index
    %c0_7 = arith.constant 0 : index
    %9 = vector.load %arg4[%c0_6, %c0_7] : memref<2x128xf32, #tpu.memory_space<vmem>>, vector<2x128xf32>
    tpu.vector_store %arg4[%c0_6, %c0_7], %8 {strides = array<i32>} : memref<2x128xf32, #tpu.memory_space<vmem>>, vector<2x128xf32>,
    %cst_8 = arith.constant dense<0xFF800000> : vector<2xf32>
    %10 = vector.multi_reduction <maximumf>, %8, %cst_8 [1] : vector<2x128xf32> to vector<2xf32>
    %11 = vector.shape_cast %10 : vector<2xf32> to vector<2x1xf32>
    %12 = tpu.iota {dimensions = array<i32: 1>} : vector<2x128xi32>
    %c128_i32 = arith.constant 128 : i32
    %13 = arith.muli %arg0, %c128_i32 : i32
    %14 = vector.broadcast %13 : i32 to vector<2x128xi32>
    %15 = arith.addi %12, %14 : vector<2x128xi32>
    %16 = vector.broadcast %11 : vector<2x1xf32> to vector<2x128xf32>
    %17 = arith.cmpf oeq, %8, %16 : vector<2x128xf32>
    %c1073741824_i32 = arith.constant 1073741824 : i32
    %18 = vector.broadcast %c1073741824_i32 : i32 to vector<2x128xi32>
    %19 = arith.select %17, %15, %18 : vector<2x128xi1>, vector<2x128xi32>
    %cst_9 = arith.constant dense<2147483647> : vector<2xi32>
    %20 = vector.multi_reduction <minsi>, %19, %cst_9 [1] : vector<2x128xi32> to vector<2xi32>
    %21 = vector.shape_cast %20 : vector<2xi32> to vector<2x1xi32>
    %c0_10 = arith.constant 0 : index
    %c0_11 = arith.constant 0 : index
    %22 = vector.load %arg7[%c0_10, %c0_11] : memref<2x1xf32, #tpu.memory_space<vmem>>, vector<2x1xf32>
    %23 = arith.maximumf %22, %11 : vector<2x1xf32>
    %c0_12 = arith.constant 0 : index
    %c0_13 = arith.constant 0 : index
    %24 = vector.load %arg8[%c0_12, %c0_13] : memref<2x1xf32, #tpu.memory_space<vmem>>, vector<2x1xf32>
    %25 = arith.subf %22, %23 : vector<2x1xf32>
    %26 = math.exp %25 : vector<2x1xf32>
    %27 = arith.mulf %24, %26 : vector<2x1xf32>
    %28 = vector.broadcast %23 : vector<2x1xf32> to vector<2x128xf32>
    %29 = arith.subf %8, %28 : vector<2x128xf32>
    %30 = math.exp %29 : vector<2x128xf32>
    %cst_14 = arith.constant dense<0.000000e+00> : vector<2xf32>
    %31 = vector.multi_reduction <add>, %30, %cst_14 [1] : vector<2x128xf32> to vector<2xf32>
    %32 = vector.shape_cast %31 : vector<2xf32> to vector<2x1xf32>
    %33 = arith.addf %27, %32 : vector<2x1xf32>
    %c0_15 = arith.constant 0 : index
    %c0_16 = arith.constant 0 : index
    %34 = vector.load %arg8[%c0_15, %c0_16] : memref<2x1xf32, #tpu.memory_space<vmem>>, vector<2x1xf32>
    tpu.vector_store %arg8[%c0_15, %c0_16], %33 {strides = array<i32>} : memref<2x1xf32, #tpu.memory_space<vmem>>, vector<2x1xf32>,
    %c0_17 = arith.constant 0 : index
    %c0_18 = arith.constant 0 : index
    %35 = vector.load %arg7[%c0_17, %c0_18] : memref<2x1xf32, #tpu.memory_space<vmem>>, vector<2x1xf32>
    tpu.vector_store %arg7[%c0_17, %c0_18], %23 {strides = array<i32>} : memref<2x1xf32, #tpu.memory_space<vmem>>, vector<2x1xf32>,
    %36 = arith.cmpf ogt, %11, %22 : vector<2x1xf32>
    %c0_19 = arith.constant 0 : index
    %c0_20 = arith.constant 0 : index
    %37 = vector.load %arg9[%c0_19, %c0_20] : memref<2x1xi32, #tpu.memory_space<vmem>>, vector<2x1xi32>
    %38 = arith.select %36, %21, %37 : vector<2x1xi1>, vector<2x1xi32>
    %c0_21 = arith.constant 0 : index
    %c0_22 = arith.constant 0 : index
    %39 = vector.load %arg9[%c0_21, %c0_22] : memref<2x1xi32, #tpu.memory_space<vmem>>, vector<2x1xi32>
    tpu.vector_store %arg9[%c0_21, %c0_22], %38 {strides = array<i32>} : memref<2x1xi32, #tpu.memory_space<vmem>>, vector<2x1xi32>,
    %c0_i32_23 = arith.constant 0 : i32
    %40 = arith.cmpi eq, %arg0, %c0_i32_23 : i32
    %41 = arith.extui %40 : i1 to i32
    %c0_i32_24 = arith.constant 0 : i32
    %42 = arith.cmpi ne, %41, %c0_i32_24 : i32
    scf.if %42 {
      %c0_25 = arith.constant 0 : index
      %c0_26 = arith.constant 0 : index
      %43 = vector.load %arg8[%c0_25, %c0_26] : memref<2x1xf32, #tpu.memory_space<vmem>>, vector<2x1xf32>
      %cst_27 = arith.constant 1.000000e+00 : f32
      %44 = vector.broadcast %cst_27 : f32 to vector<2x1xf32>
      %45 = arith.divf %44, %43 : vector<2x1xf32>
      %46 = vector.shape_cast %45 : vector<2x1xf32> to vector<2x1xf32>
      %47 = vector.broadcast %46 : vector<2x1xf32> to vector<2x128xf32>
      %c0_28 = arith.constant 0 : index
      %c0_29 = arith.constant 0 : index
      %48 = vector.load %arg5[%c0_28, %c0_29] : memref<2x128xf32, #tpu.memory_space<vmem>>, vector<2x128xf32>
      tpu.vector_store %arg5[%c0_28, %c0_29], %47 {strides = array<i32>} : memref<2x128xf32, #tpu.memory_space<vmem>>, vector<2x128xf32>,
      %c0_30 = arith.constant 0 : index
      %c0_31 = arith.constant 0 : index
      %49 = vector.load %arg9[%c0_30, %c0_31] : memref<2x1xi32, #tpu.memory_space<vmem>>, vector<2x1xi32>
      %50 = vector.shape_cast %49 : vector<2x1xi32> to vector<2x1xi32>
      %51 = vector.broadcast %50 : vector<2x1xi32> to vector<2x128xi32>
      %c0_32 = arith.constant 0 : index
      %c0_33 = arith.constant 0 : index
      %52 = vector.load %arg6[%c0_32, %c0_33] : memref<2x128xi32, #tpu.memory_space<vmem>>, vector<2x128xi32>
      tpu.vector_store %arg6[%c0_32, %c0_33], %51 {strides = array<i32>} : memref<2x128xi32, #tpu.memory_space<vmem>>, vector<2x128xi32>,
    } else {
    }
    return
  }
  func.func @transform_0(%arg0: i32) -> (i32, i32) {
    %c0_i32 = arith.constant 0 : i32
    %c0_i32_0 = arith.constant 0 : i32
    %c0_i32_1 = arith.constant 0 : i32
    return %c0_i32, %c0_i32_0 : i32, i32
  }
  func.func @transform_1(%arg0: i32) -> (i32, i32) {
    %c0_i32 = arith.constant 0 : i32
    %c0_i32_0 = arith.constant 0 : i32
    return %c0_i32, %arg0 : i32, i32
  }
  func.func @transform_2(%arg0: i32) -> (i32, i32) {
    %c0_i32 = arith.constant 0 : i32
    %c0_i32_0 = arith.constant 0 : i32
    return %c0_i32, %arg0 : i32, i32
  }
  func.func @transform_3(%arg0: i32) -> (i32, i32) {
    %c0_i32 = arith.constant 0 : i32
    %c0_i32_0 = arith.constant 0 : i32
    return %c0_i32, %arg0 : i32, i32
  }
  func.func @transform_4(%arg0: i32) -> (i32, i32) {
    %c0_i32 = arith.constant 0 : i32
    %c0_i32_0 = arith.constant 0 : i32
    %c0_i32_1 = arith.constant 0 : i32
    return %c0_i32, %c0_i32_0 : i32, i32
  }
  func.func @transform_5(%arg0: i32) -> (i32, i32) {
    %c0_i32 = arith.constant 0 : i32
    %c0_i32_0 = arith.constant 0 : i32
    %c0_i32_1 = arith.constant 0 : i32
    return %c0_i32, %c0_i32_0 : i32, i32
  }
}

</mosaic_0001>

<bundles_post_ra>
// kernel: replace_forward.3
= control target key start
LH: loop header
LB: loop body
LE: loop exit
PB: predicated region body
PF: predicated region fallthrough
CT: control target
= control target key end

     0   :  { %s327_s0 = inlined_call_operand.vmem [shape: bf16[2,64], index: 0, kind: input, shape index: {}]   ;;  %s328_s1 = inlined_call_operand.vmem [shape: bf16[64,128], index: 1, kind: input, shape index: {}]   ;;  %s329_s2 = inlined_call_operand.vmem [shape: f32[1,128], index: 2, kind: input, shape index: {}]   ;;  %s330_s3 = inlined_call_operand.hbm [shape: f32[2,128], index: 3, kind: output, shape index: {0}]   ;;  %s331_s4 = inlined_call_operand.vmem [shape: f32[2,128], index: 4, kind: output, shape index: {1}]   ;;  %s332_s5 = inlined_call_operand.vmem [shape: s32[2,128], index: 5, kind: output, shape index: {2}]  }
   0x1   :  { %v210_v0 = vld [vmem:[%s328_s1 + $0x18] sm:$0xff]  ;;  %v209_v1 = vld [vmem:[%s328_s1 + $0x10] sm:$0xff] }
   0x2   :  { %74 = vmatpush.bf16.msra.mxu0 %v210_v0 }
   0x3   :  { %11 = vsyncpa [#allocation6], 0  ;;  %v208_v2 = vld [vmem:[%s328_s1 + $0x8] sm:$0xff]  ;;  %v207_v3 = vld [vmem:[%s328_s1] sm:$0xff]  ;;  %vm66_vm0 = vcmask 523264   ;;  %vm84_vm1 = vcmask 1041408   ;;  %v88_v13 = vlaneseq }
   0x4   :  { %v29_v4 = vld [vmem:[%s327_s0] sm:$0x1]  ;;  %vm23_vm2 = vcmask 1024   ;;  %v251_v10 = vmov -inf   ;;  %v252_v11 = vmov 0   ;;  %v253_v12 = vmov 0.0  }
   0x5   :  { %v218_v5 = vld [vmem:[%s329_s2] ss:$0 sm:$0xff]  ;;  %24 = vst.msk [vmem:[#allocation2] sm:$0x3] %vm23_vm2, %v251_v10  ;;  %215 = vset.pattern.permute.xlu0 %v252_v11  ;;  %217 = vset.pattern.permute.xlu1 %v252_v11  ;;  %v89_v15 = vand.u32 127, %v88_v13  ;;  %s254_s6 = smov [#allocation5]  }
   0x6   :  { %75 = vmatpush.bf16.msra.mxu0 %v209_v1  ;;  %26 = vst.msk [vmem:[#allocation4] sm:$0x3] %vm23_vm2, %v252_v11  ;;  %216 = vset.pattern.permute.xlu2 %v252_v11  ;;  %s171_s7 = sshll.u32 %s254_s6, 4  ;;  %s173_s10 = sshll.u32 %s330_s3, 4  ;;  %s172_s7 = int_to_ptr.vmem [resolvable:$true] %s171_s7  ;;  %s174_s10 = int_to_ptr.hbm [resolvable:$true] %s173_s10 }
   0x7   :  { %28 = vst [vmem:[%s332_s5] sm:$0x3] %v252_v11 }
   0x8   :  { %25 = vst.msk [vmem:[#allocation3] sm:$0x3] %vm23_vm2, %v253_v12 }
   0x9   :  { %27 = vst [vmem:[%s331_s4] sm:$0x3] %v253_v12 }
   0xa   :  { %76 = vmatpush.bf16.msra.mxu0 %v208_v2 }
   0xc   :  { %v110_v14 = vld [vmem:[#allocation2] sm:$0x3] }
   0xd   :  { %v133_v39 = vld [vmem:[#allocation4] sm:$0x3] }
   0xe   :  { %77 = vmatpush.bf16.msra.mxu0 %v207_v3 }
   0xf   :  { %v112_v36 = vld [vmem:[#allocation3] sm:$0x3] }
  0x11   :  { %206 = vmatmul.msk.bf16.vlgmr.msra.gmra.mxu0 %vm66_vm0, %v29_v4 }
  0x8e   :  { %v79_v6 = vpop.f32.mrf.mxu0 }
  0x8f   :  { %v80_v7 = vadd.f32 %v218_v5, %v79_v6 }
  0x91   :  { %83 = vst [vmem:[#allocation5] sm:$0x3] %v80_v7  ;;  %v85_v8 = vsel %vm84_vm1, %v80_v7, -inf }
  0x92   :  { %86 = vmax.xlane.f32.xlu0 %v85_v8  ;;  %176 = dma.vmem_to_hbm [thread:$0]  %s172_s7, 32, %s174_s10, [#allocation6]  }
  0x96   :  { %v81_v9 = vpop.f32.mrf.mxu0 }
 0x105   :  { %v87_v16 = vpop.xlane.xlu0 %86 }
 0x106   :  { %vm93_vm3 = vcmp.eq.f32.partialorder %v80_v7, %v87_v16  ;;  %v111_v17 = vmax.f32 %v110_v14, %v87_v16  ;;  %vm132_vm5 = vcmp.gt.f32.partialorder %v87_v16, %v110_v14 }
 0x107   :  { %v94_v18 = vsel %vm93_vm3, %v89_v15, 1073741824 }
 0x108   :  { %v113_v19 = vsub.f32 %v110_v14, %v111_v17  ;;  %131 = vst.msk [vmem:[#allocation2] sm:$0x3] %vm23_vm2, %v111_v17  ;;  %119 = vperm.xlu0 %215, %v111_v17   ;;  %v95_v20 = vsel %vm84_vm1, %v94_v18, 2147483647 }
 0x109   :  { %v97_v21 = vshra.s32 %v95_v20, 16  ;;  %v96_v25 = vand.u32 65535, %v95_v20 }
 0x10a   :  { %v114_v32 = vmul.f32 1.442695, %v113_v19 }
 0x10b   :  { %v99_v22 = vcvt.s32.f32 %v97_v21  ;;  %v98_v28 = vcvt.s32.f32 %v96_v25 }
 0x10d   :  { %100 = vmin.xlane.f32.xlu1 %v99_v22 }
 0x17a   :  { %v120_v23 = vpop.permute.xlu0 %119 }
 0x17b   :  { %v122_v24 = vsub.f32 %v80_v7, %v120_v23 }
 0x17d   :  { %v123_v26 = vmul.f32 1.442695, %v122_v24 }
 0x17f   :  { %219 = vpow2.f32 %v123_v26 }
 0x180   :  { %v101_v27 = vpop.xlane.xlu1 %100  ;;  %221 = vpow2.f32 %v114_v32 }
 0x181   :  { %vm102_vm4 = vcmp.eq.f32.partialorder %v99_v22, %v101_v27  ;;  %v107_v33 = vcvt.f32.s32 %v101_v27 }
 0x182   :  { %v103_v29 = vsel %vm102_vm4, %v98_v28, inf }
 0x183   :  { %104 = vmin.xlane.f32.xlu2 %v103_v29  ;;  %v108_v37 = vshll.u32 %v107_v33, 16 }
 0x185   :  { %v220_v30 = vpop.eup %219 }
 0x186   :  { %v125_v31 = vsel %vm84_vm1, %v220_v30, 0.0  ;;  %v222_v34 = vpop.eup %221 }
 0x187   :  { %126 = vadd.xlane.f32.xlu1 %v125_v31  ;;  %v116_v41 = vmul.f32 %v222_v34, %v112_v36 }
 0x1f6   :  { %v105_v35 = vpop.xlane.xlu2 %104 }
 0x1f7   :  { %v106_v38 = vcvt.f32.s32 %v105_v35 }
 0x1f9   :  { %v109_v40 = vadd.s32 %v108_v37, %v106_v38 }
 0x1fa   :  { %v127_v42 = vpop.xlane.xlu1 %126 }
 0x1fb   :  { %v134_v43 = vsel %vm132_vm5, %v109_v40, %v133_v39  ;;  %v128_v44 = vadd.f32 %v127_v42, %v116_v41 }
 0x1fc   :  { %135 = vst.msk [vmem:[#allocation4] sm:$0x3] %vm23_vm2, %v134_v43 }
 0x1fd   :  { %130 = vst.msk [vmem:[#allocation3] sm:$0x3] %vm23_vm2, %v128_v44 }
 0x203   :  { %v161_v45 = vld [vmem:[#allocation4] sm:$0x3] }
 0x204   :  { %163 = vperm.xlu1 %217, %v161_v45   ;;  %v139_v46 = vld [vmem:[#allocation3] sm:$0x3] }
 0x205   :  { %223 = vrcp.f32 %v139_v46  ;;  %v151_v50 = vand.u32 2147483648, %v139_v46  ;;  %v149_v52 = vand.u32 2147483647, %v139_v46  ;;  %vm145_vm7 = vweird.f32 %v139_v46 }
 0x207   :  { %v152_v54 = vor.u32 1.1754944e-38, %v151_v50  ;;  %vm150_vm9 = vcmp.eq.f32.partialorder %v149_v52, 8.507059e+37 }
 0x20b   :  { %v224_v47 = vpop.eup %223 }
 0x20c   :  { %v141_v48 = vmul.f32 %v224_v47, %v139_v46  ;;  %vm146_vm6 = vweird.f32 %v224_v47 }
 0x20d   :  { %vm147_vm8 = vmor %vm145_vm7, %vm146_vm6 }
 0x20e   :  { %v142_v49 = vsub.f32 1.0, %v141_v48 }
 0x210   :  { %v143_v51 = vmul.f32 %v224_v47, %v142_v49 }
 0x212   :  { %v144_v53 = vadd.f32 %v224_v47, %v143_v51 }
 0x214   :  { %v148_v55 = vsel %vm147_vm8, %v224_v47, %v144_v53 }
 0x215   :  { %v153_v56 = vsel %vm150_vm9, %v152_v54, %v148_v55 }
 0x216   :  { %157 = vperm.xlu2 %216, %v153_v56  }
 0x270   :  { %v158_v57 = vpop.permute.xlu2 %157 }
 0x271   :  { %160 = vst [vmem:[%s331_s4] sm:$0x3] %v158_v57 }
 0x276   :  { %v164_v58 = vpop.permute.xlu1 %163 }
 0x277   :  { %165 = vst [vmem:[%s332_s5] sm:$0x3] %v164_v58 }
 0x278   :  { %249 = dma.done.wait [#allocation6], 32  }
 0x279   :  { %250 = vsyncadd [#allocation6], 4294967264 }
 0x27a   :  { %189 = vsyncpa [#allocation6], 1 }

// kernel: replace_forward.2
= control target key start
LH: loop header
LB: loop body
LE: loop exit
PB: predicated region body
PF: predicated region fallthrough
CT: control target
= control target key end

     0   :  { %s649_s15 = smov 0   ;;  %s651_s16 = smov 0   ;;  %s729_s0 = inlined_call_operand.vmem [shape: s32[2,1], index: 0, kind: input, shape index: {}]   ;;  %s730_s1 = inlined_call_operand.vmem [shape: f32[2,8,2,96], index: 1, kind: input, shape index: {}]   ;;  %s731_s2 = inlined_call_operand.vmem [shape: bf16[2,32,96], index: 2, kind: input, shape index: {}]   ;;  %s732_s3 = inlined_call_operand.vmem [shape: f32[2,1,32], index: 3, kind: input, shape index: {}]   ;;  %s733_s4 = inlined_call_operand.vmem [shape: f32[2,2,32], index: 4, kind: output, shape index: {}]  }
   0x1   :  { %s653_s17 = smov 0   ;;  %s655_s18 = smov 0  }
   0x2   :  { %s657_s19 = smov 0  }
   0x3 LB: > { %s23_s20 = sadd.s32 1, %s609_s17  ;;  %s26_s21 = sadd.s32 1, %s613_s18  ;;  %s617_s19 = sphi %s657_s19, %s14_s19   ;;  %s613_s18 = sphi %s655_s18, %s737_s18   ;;  %s609_s17 = sphi %s653_s17, %s736_s17   ;;  %s605_s16 = sphi %s651_s16, %s735_s16   ;;  %s601_s15 = sphi %s649_s15, %s734_s15  }
   0x4   : > { %p24_p0 = scmp.ge.s32.totalorder %s23_s20, 8  ;;  %p501_p1 = scmp.ge.s32.totalorder %s617_s19, 1 }
   0x5   : > { %p213_p2 = scmp.lt.s32.totalorder %s617_s19, 17 }
   0x6   : > { %s739_s20 = smov (%p24_p0, %s23_s20), 0  ;;  %s741_s21 = smov (!%p24_p0, %s26_s21), %s613_s18 }
   0x7   : > { %p214_p3 = pnand %p501_p1, %p213_p2  ;;  %p28_p4 = scmp.ge.s32.totalorder %s741_s21, 2 }
   0x8   : > { %s502_s22 = sshll.u32 (!%p214_p3), %s601_s15, 1  ;;  %p257_p5 = scmp.lt.s32.totalorder (!%p214_p3), %s605_s16, 1 }
   0x9   : > { %s743_s21 = smov (%p28_p4, %s741_s21), 0  ;;  %217 = sbr.rel (%p214_p3) target bundleno = 638 (0x27e), region = 36 }
   0xa   : > { %s254_s23 = ssub.s32 (!%p214_p3), 7, %s502_s22  ;;  %p508_p7 = scmp.ne.s32.totalorder (!%p214_p3), %s601_s15, 0 }
   0xb   : > { %s255_s24 = smul.u32 (!%p214_p3), %s605_s16, %s254_s23 }
   0xd   : > { %s683_s25 = sadd.s32 (!%p214_p3), %s601_s15, %s255_s24 }
   0xe   : > { %s745_s16 = smov (!%p257_p5, %s605_s16), 1  ;;  %p259_p6 = scmp.lt.s32.totalorder %s683_s25, 7 }
   0xf   : > { %s503_s26 = sshll.u32 %s745_s16, 3  ;;  %s522_s27 = sshll.u32 %s745_s16, 4 }
  0x10   : > { %s276_s30 = scalar_lea.vmem %s732_s3, %s745_s16  ;;  %s273_s8 = scalar_lea.vmem %s731_s2, %s522_s27 }
  0x11   : > { %s260_s5 = scalar_select %p259_p6, %s683_s25, 7 }
  0x12   : > { %s507_s9 = sshll.u32 %s745_s16, 1  ;;  %285 = sbr.rel (%p508_p7) target bundleno = 26 (0x1a), region = 40 }
  0x13   : > { %s262_s10 = sadd.s32 %s503_s26, %s260_s5  ;;  %s696_s13 = scalar_lea.vmem %s733_s4, %s507_s9 }
  0x14   : > { %s504_s14 = sshll.u32 %s262_s10, 1 }
  0x15   : > { %s264_s24 = scalar_lea.vmem %s730_s1, %s504_s14 }
  0x17   : > { %vm286_vm0 = vcmask 254976   ;;  %v619_v0 = vmov 0.0  }
  0x18   : > { %287 = vst.msk [vmem:[#allocation2] sm:$0x3] %vm286_vm0, %v619_v0 }
  0x19   : > { %288 = vst.msk [vmem:[%s696_s13] sm:$0x3] %vm286_vm0, %v619_v0 }
  0x1a PF: > { %v524_v1 = vld [vmem:[%s273_s8 + $0x8] sm:$0xff]  ;;  %v572_v3 = vld [vmem:[%s276_s30] ss:$0 sm:$0xff]  ;;  %s620_s16 = smov 32   ;;  %s621_s26 = smov 64   ;;  %vm308_vm1 = vcmask 261120   ;;  %v386_v29 = vstv %s683_s25 }
  0x1b   : > { %318 = vmatpush.bf16.msra.mxu0 %v524_v1  ;;  %v523_v4 = vld [vmem:[%s273_s8] sm:$0xff]  ;;  %348 = vrot.lane.b32.xlu0 %v572_v3, %s621_s26  ;;  %v622_v30 = vmov 0   ;;  %s623_s28 = smov 96   ;;  %vm379_vm8 = vcmask 254976  }
  0x1c   : > { %v290_v10 = vld [vmem:[%s264_s24] sm:$0x3]  ;;  %570 = vset.pattern.permute.xlu2 %v622_v30  ;;  %571 = vset.pattern.permute.xlu0 %v622_v30 }
  0x1d   : > { %v385_v28 = vld [vmem:[%s729_s0] sm:$0x3] }
  0x1e   : > { %vm387_vm6 = vcmp.eq.s32.totalorder %v385_v28, %v386_v29 }
  0x1f   : > { %v289_v2 = vld [vmem:[#allocation2] sm:$0x3]  ;;  %319 = vmatpush.bf16.msra.mxu0 %v523_v4  ;;  %v389_v31 = vsel %vm387_vm6, 1, %v622_v30 }
  0x20   : > { %370 = vrot.lane.b32.xlu2 %v289_v2, %s620_s16  ;;  %v291_v5 = vpack.c.bf16 %v289_v2, %v289_v2  ;;  %v388_v27 = vld [vmem:[%s696_s13] sm:$0x3] }
  0x22   : > { %517 = vmatmul.msk.bf16.vlgmr.msra.gmra.mxu0 %vm308_vm1, %v291_v5 }
  0x28   : > { %391 = vperm.xlu2 %570, %v389_v31  }
  0x7a   : > { %v371_v35 = vpop.permute.xlu2 %370 }
  0x82   : > { %v392_v37 = vpop.permute.xlu2 %391 }
  0x83   : > { %vm393_vm7 = vcmp.eq.s32.totalorder %v392_v37, 1 }
  0x8d   : > { %v349_v6 = vpop.permute.xlu0 %348 }
  0x9f   : > { %v321_v7 = vpop.f32.mrf.mxu0 }
  0xa0   : > { %v351_v8 = vadd.f32 %v349_v6, %v321_v7  ;;  %v325_v11 = vadd.f32 %v321_v7, %v290_v10 }
  0xa2   : > { %353 = vrot.lane.b32.xlu0 %v351_v8, %s621_s26  ;;  %v518_v12 = vmul.f32 -1.442695, %v325_v11 }
  0xa4   : > { %573 = vpow2.f32 %v518_v12 }
  0xa7   : > { %v323_v9 = vpop.f32.mrf.mxu0 }
  0xaa   : > { %v574_v13 = vpop.eup %573  ;;  %395 = vrot.lane.b32.xlu0 %v388_v27, %s620_s16 }
  0xab   : > { %v329_v14 = vadd.f32 1.0, %v574_v13 }
  0xad   : > { %575 = vrcp.f32 %v329_v14  ;;  %v341_v20 = vand.u32 2147483648, %v329_v14  ;;  %vm335_vm3 = vweird.f32 %v329_v14  ;;  %v339_v21 = vand.u32 2147483647, %v329_v14 }
  0xaf   : > { %v342_v23 = vor.u32 1.1754944e-38, %v341_v20  ;;  %vm340_vm5 = vcmp.eq.f32.partialorder %v339_v21, 8.507059e+37 }
  0xb3   : > { %v576_v15 = vpop.eup %575 }
  0xb4   : > { %v331_v16 = vmul.f32 %v576_v15, %v329_v14  ;;  %vm336_vm2 = vweird.f32 %v576_v15 }
  0xb5   : > { %vm337_vm4 = vmor %vm335_vm3, %vm336_vm2 }
  0xb6   : > { %v332_v17 = vsub.f32 1.0, %v331_v16 }
  0xb8   : > { %v333_v18 = vmul.f32 %v576_v15, %v332_v17 }
  0xba   : > { %v334_v19 = vadd.f32 %v576_v15, %v333_v18 }
  0xbc   : > { %v338_v22 = vsel %vm337_vm4, %v576_v15, %v334_v19 }
  0xbd   : > { %v343_v24 = vsel %vm340_vm5, %v342_v23, %v338_v22 }
  0xbe   : > { %v363_v36 = vsub.f32 1.0, %v343_v24  ;;  %v373_v39 = vmul.f32 %v371_v35, %v343_v24 }
 0x114   : > { %v354_v25 = vpop.permute.xlu0 %353 }
 0x115   : > { %v356_v26 = vmul.f32 %v354_v25, %v343_v24 }
 0x117   : > { %358 = vrot.lane.b32.xlu1 %v356_v26, %s621_s26 }
 0x11c   : > { %v396_v41 = vpop.permute.xlu0 %395 }
 0x189   : > { %v359_v32 = vpop.permute.xlu1 %358 }
 0x18a   : > { %v361_v33 = vadd.f32 %v359_v32, %v290_v10 }
 0x18c   : > { %577 = vtanh.f32 %v361_v33 }
 0x192   : > { %v578_v34 = vpop.eup %577 }
 0x193   : > { %365 = vrot.lane.b32.xlu1 %v578_v34, %s623_s28 }
 0x205   : > { %v366_v38 = vpop.permute.xlu1 %365 }
 0x206   : > { %v368_v40 = vmul.f32 %v366_v38, %v363_v36 }
 0x208   : > { %v374_v42 = vadd.f32 %v373_v39, %v368_v40 }
 0x20a   : > { %376 = vrot.lane.b32.xlu1 %v374_v42, %s623_s28  ;;  %v398_v43 = vsel %vm393_vm7, %v374_v42, %v396_v41 }
 0x20b   : > { %400 = vrot.lane.b32.xlu2 %v398_v43, %s623_s28 }
 0x265   : > { %v401_v44 = vpop.permute.xlu2 %400 }
 0x266   : > { %403 = vst.msk [vmem:[%s696_s13] sm:$0x3] %vm379_vm8, %v401_v44 }
 0x27c   : > { %v377_v45 = vpop.permute.xlu1 %376 }
 0x27d   : > { %380 = vst.msk [vmem:[#allocation2] sm:$0x3] %vm379_vm8, %v377_v45 }
 0x27e PF: > { %s14_s19 = sadd.s32 1, %s617_s19   ;;  %s734_s15 = smov %s609_s17 }
 0x27f   : > { %p11_p8 = scmp.ge.s32.totalorder %s14_s19, 18   ;;  %s735_s16 = smov %s613_s18 }
 0x280   : > { %s736_s17 = smov %s739_s20  ;;  %s737_s18 = smov %s743_s21 }
 0x281   :  { %13 = sbr.rel (!%p11_p8) target bundleno = 3 (0x3), region = 76 }

</bundles_post_ra>
